<compile_context>
chip_gen: v5e
topology: v5e:2x2
jax: 0.10.0
libtpu: 0.0.40
codegen_flags: <defaults>
</compile_context>

<pallas_src>
import functools
import numpy as np
import jax
import jax.numpy as jnp
from jax.experimental import pallas as pl
from jax.experimental.pallas import tpu as pltpu


_SQRT_2_OVER_PI = 0.7978845608028654


def _gelu_tanh(h):
    # tanh-approximation GELU (computed in the dtype of `h`).
    return 0.5 * h * (1.0 + jnp.tanh(_SQRT_2_OVER_PI * (h + 0.044715 * h * h * h)))


def _round_up(n, m):
    return ((n + m - 1) // m) * m


def _divisor_tile(total, target):
    """Largest multiple of 128 that divides `total` (a multiple of 128) and is <= target."""
    t = min(max((target // 128) * 128, 128), total)
    while total % t:
        t -= 128
    return t


def _tpu_generation():
    try:
        kind = jax.devices()[0].device_kind.lower()
    except Exception:
        return "unknown"
    if "v5 lite" in kind or "v5e" in kind or "v5lite" in kind:
        return "v5e"
    if "v6" in kind:
        return "v6e"
    if "v7" in kind or "7x" in kind:
        return "v7x"
    if "v5" in kind:
        return "v5p"
    return "unknown"


def _vmem_capacity_bytes(gen):
    try:
        cap = int(getattr(pltpu.get_tpu_info(), "vmem_capacity_bytes", 0))
        if cap > 0:
            return cap
    except Exception:
        pass
    # Conservative fallbacks (per-TC): v5e/v6e/v5p 128 MiB, v7x / unknown 64 MiB.
    return {"v5e": 128, "v6e": 128, "v5p": 128, "v7x": 64}.get(gen, 64) * 1024 * 1024


# --------------------------------------------------------------------------
# Kernels
# --------------------------------------------------------------------------

def _mlp_kernel_resident(x_ref, w1_ref, b1_ref, w2_ref, b2_ref, o_ref, *, gelu_dtype):
    # Weights fully VMEM-resident (constant block index across the whole grid):
    # single grid axis over row tiles, no accumulator scratch needed.
    h = jnp.dot(x_ref[...], w1_ref[...], preferred_element_type=jnp.float32)
    h = (h + b1_ref[...]).astype(gelu_dtype)
    g = _gelu_tanh(h)
    y = jnp.dot(g.astype(w2_ref.dtype), w2_ref[...], preferred_element_type=jnp.float32)
    o_ref[...] = (y + b2_ref[...]).astype(o_ref.dtype)


def _mlp_kernel_stream(x_ref, w1_ref, b1_ref, w2_ref, b2_ref, o_ref, acc_ref, *, gelu_dtype):
    # Dff streamed along grid axis 1 ("arbitrary"); f32 VMEM accumulator.
    k = pl.program_id(1)

    @pl.when(k == 0)
    def _():
        acc_ref[...] = jnp.zeros_like(acc_ref)

    h = jnp.dot(x_ref[...], w1_ref[...], preferred_element_type=jnp.float32)
    h = (h + b1_ref[...]).astype(gelu_dtype)
    g = _gelu_tanh(h)
    acc_ref[...] += jnp.dot(g.astype(w2_ref.dtype), w2_ref[...],
                            preferred_element_type=jnp.float32)

    @pl.when(k == pl.num_programs(1) - 1)
    def _():
        o_ref[...] = (acc_ref[...] + b2_ref[...]).astype(o_ref.dtype)


# --------------------------------------------------------------------------
# Tile / residency selection
# --------------------------------------------------------------------------

def _choose_config(M, D_pad, Dff_pad, cbytes, obytes, gbytes, vmem_cap, gen,
                   user_tm, user_tff):
    budget = int(0.70 * vmem_cap)   # what our own buffers may use

    # Streaming arithmetic intensity ~= tm FLOP/byte, so target the ridge.
    tm_target = user_tm if user_tm is not None else {"v6e": 1024, "v7x": 512}.get(gen, 512)
    tm_target = max(16, _round_up(tm_target, 16))
    tm = min(tm_target, _round_up(M, 16))
    # v7x: keep >= 2 row tiles so the "parallel" axis feeds both TensorCores.
    if gen == "v7x" and M > 16 and _round_up(M, tm) == tm:
        tm = min(tm, _round_up(-(-M // 2), 16))

    def est_resident(tm_):
        return (2 * tm_ * D_pad * (cbytes + obytes)      # x + out tiles (double-buffered)
                + 2 * 2 * D_pad * Dff_pad * cbytes       # W1 + W2 (double-buffered)
                + 2 * (Dff_pad + D_pad) * 4              # biases (f32)
                + tm_ * Dff_pad * gbytes)                # h/g intermediate

    def est_stream(tm_, tff_):
        return (2 * tm_ * D_pad * (cbytes + obytes)
                + 2 * 2 * D_pad * tff_ * cbytes
                + 2 * (tff_ + D_pad) * 4
                + tm_ * D_pad * 4                        # f32 accumulator scratch
                + tm_ * tff_ * gbytes)

    # Preferred: fully VMEM-resident weights (weights DMA'd exactly once).
    if user_tff is None or user_tff >= Dff_pad:
        tm_res = tm
        while tm_res > 16 and est_resident(tm_res) > budget:
            tm_res = max(16, _round_up(tm_res // 2, 16))
        if est_resident(tm_res) <= budget:
            return dict(resident=True, tm=tm_res, tff=Dff_pad,
                        vmem_est=est_resident(tm_res))

    # Fallback: stream Dff chunks; shrink tff first, then tm.
    tff = _divisor_tile(Dff_pad, user_tff if user_tff is not None else 512)
    while tff > 128 and est_stream(tm, tff) > budget:
        tff = _divisor_tile(Dff_pad, max(128, tff // 2))
    while tm > 16 and est_stream(tm, tff) > budget:
        tm = max(16, _round_up(tm // 2, 16))
    return dict(resident=False, tm=tm, tff=tff, vmem_est=est_stream(tm, tff))


# --------------------------------------------------------------------------
# Wrapper
# --------------------------------------------------------------------------

def make_mlp(w1, b1, w2, b2, *, tm=None, tff=None,
             compute_dtype=jnp.bfloat16, gelu_dtype=None, out_dtype=None):
    """Prepare (cast+pad) params once; returns apply(x) computing
    y = GELU(x @ W1 + b1) @ W2 + b2 for x of shape [B, S, D]."""
    D, Dff = w1.shape
    assert w2.shape == (Dff, D) and b1.shape == (Dff,) and b2.shape == (D,)

    gen = _tpu_generation()
    vmem_cap = _vmem_capacity_bytes(gen)
    if gelu_dtype is None:
        # v6e/v7x have bf16 VPU + EUP paths; v5e (and unknown) keep f32.
        gelu_dtype = jnp.bfloat16 if gen in ("v6e", "v7x") else jnp.float32

    D_pad = _round_up(D, 128)
    Dff_pad = _round_up(Dff, 128)

    def _prep(a, rows, cols, dtype):
        if a.dtype != dtype:
            a = a.astype(dtype)
        pr, pc = rows - a.shape[0], cols - a.shape[1]
        if pr or pc:
            a = jnp.pad(a, ((0, pr), (0, pc)))
        return a

    # Cast + pad parameters once (not per call).
    w1p = _prep(w1, D_pad, Dff_pad, compute_dtype)
    w2p = _prep(w2, Dff_pad, D_pad, compute_dtype)
    b1p = _prep(b1.reshape(1, Dff), 1, Dff_pad, jnp.float32)
    b2p = _prep(b2.reshape(1, D), 1, D_pad, jnp.float32)

    cbytes = np.dtype(compute_dtype).itemsize
    gbytes = np.dtype(gelu_dtype).itemsize

    def apply(x):
        B, S, Dx = x.shape
        assert Dx == D
        M = B * S
        odt = out_dtype if out_dtype is not None else x.dtype
        obytes = np.dtype(odt).itemsize

        cfg = _choose_config(M, D_pad, Dff_pad, cbytes, obytes, gbytes,
                             vmem_cap, gen, tm, tff)
        tm_, tff_ = cfg["tm"], cfg["tff"]
        M_pad = _round_up(M, tm_)
        n_rows = M_pad // tm_

        # x padding: skipped when already aligned; padded rows/cols contribute
        # exactly zero to the kept output region (sliced off below).
        xm = x.reshape(M, D)
        if xm.dtype != compute_dtype:
            xm = xm.astype(compute_dtype)
        if (M_pad - M) or (D_pad - D):
            xm = jnp.pad(xm, ((0, M_pad - M), (0, D_pad - D)))

        # ~30% over estimate, capped at ~85% of physical VMEM (Mosaic headroom).
        vmem_limit = min(int(0.85 * vmem_cap),
                         max(int(1.3 * cfg["vmem_est"]), 32 * 1024 * 1024))

        weight_bytes = 2 * D * Dff * cbytes
        restream = 1 if cfg["resident"] else n_rows
        cost = pl.CostEstimate(
            flops=4 * M * D * Dff,
            transcendentals=M * Dff,
            bytes_accessed=(M * D * cbytes + restream * weight_bytes
                            + (Dff + D) * 4 + M * D * obytes),
        )

        if cfg["resident"]:
            kernel = functools.partial(_mlp_kernel_resident, gelu_dtype=gelu_dtype)
            grid_spec = pltpu.PrefetchScalarGridSpec(
                num_scalar_prefetch=0,
                grid=(n_rows,),
                in_specs=[
                    pl.BlockSpec((tm_, D_pad), lambda i: (i, 0)),       # activation rows
                    pl.BlockSpec((D_pad, Dff_pad), lambda i: (0, 0)),   # W1 (resident)
                    pl.BlockSpec((1, Dff_pad), lambda i: (0, 0)),       # b1
                    pl.BlockSpec((Dff_pad, D_pad), lambda i: (0, 0)),   # W2 (resident)
                    pl.BlockSpec((1, D_pad), lambda i: (0, 0)),         # b2
                ],
                out_specs=pl.BlockSpec((tm_, D_pad), lambda i: (i, 0)),
            )
            dims = ("parallel",)
            scratch_note = "resident"
        else:
            kernel = functools.partial(_mlp_kernel_stream, gelu_dtype=gelu_dtype)
            grid_spec = pltpu.PrefetchScalarGridSpec(
                num_scalar_prefetch=0,
                grid=(n_rows, Dff_pad // tff_),
                in_specs=[
                    pl.BlockSpec((tm_, D_pad), lambda i, k: (i, 0)),    # activation rows
                    pl.BlockSpec((D_pad, tff_), lambda i, k: (0, k)),   # W1 Dff-chunk
                    pl.BlockSpec((1, tff_), lambda i, k: (0, k)),       # b1 chunk
                    pl.BlockSpec((tff_, D_pad), lambda i, k: (k, 0)),   # W2 Dff-chunk
                    pl.BlockSpec((1, D_pad), lambda i, k: (0, 0)),      # b2
                ],
                out_specs=pl.BlockSpec((tm_, D_pad), lambda i, k: (i, 0)),
                scratch_shapes=[pltpu.VMEM((tm_, D_pad), jnp.float32)],
            )
            dims = ("parallel", "arbitrary")
            scratch_note = "streaming"
        del scratch_note  # (informational only)

        out2 = pl.pallas_call(
            kernel,
            out_shape=jax.ShapeDtypeStruct((M_pad, D_pad), odt),
            grid_spec=grid_spec,
            compiler_params=pltpu.CompilerParams(
                dimension_semantics=dims,
                vmem_limit_bytes=vmem_limit,
            ),
            cost_estimate=cost,
        )(xm, w1p, b1p, w2p, b2p)

        return out2[:M, :D].reshape(B, S, D)

    return apply


def mlp_layer(x, w1, b1, w2, b2, **kwargs):
    """One-shot convenience wrapper (prepares params on every call)."""
    return make_mlp(w1, b1, w2, b2, **kwargs)(x)


if __name__ == "__main__":
    # Small shapes consistent with a transformer encoder MLP block.
    B, S, D = 2, 8, 32
    Dff = 4 * D  # 128

    key = jax.random.PRNGKey(0)
    kx, k1, k2, k3, k4 = jax.random.split(key, 5)

    x = jax.random.normal(kx, (B, S, D), dtype=jnp.float32)
    w1 = jax.random.normal(k1, (D, Dff), dtype=jnp.float32) * 0.02
    b1 = jax.random.normal(k2, (Dff,), dtype=jnp.float32) * 0.02
    w2 = jax.random.normal(k3, (Dff, D), dtype=jnp.float32) * 0.02
    b2 = jax.random.normal(k4, (D,), dtype=jnp.float32) * 0.02

    mlp = make_mlp(w1, b1, w2, b2)   # params cast/padded once here
    y = mlp(x)
    jax.block_until_ready(y)

    # Precision-matched pure-JAX reference (same dtype chain as the kernel).
    gen = _tpu_generation()
    gelu_dtype = jnp.bfloat16 if gen in ("v6e", "v7x") else jnp.float32
    xr = x.reshape(-1, D).astype(jnp.bfloat16)
    h_ref = (jnp.dot(xr, w1.astype(jnp.bfloat16),
                     preferred_element_type=jnp.float32) + b1).astype(gelu_dtype)
    g_ref = _gelu_tanh(h_ref)
    y_ref = (jnp.dot(g_ref.astype(jnp.bfloat16), w2.astype(jnp.bfloat16),
                     preferred_element_type=jnp.float32) + b2).reshape(B, S, D)
    err = float(jnp.max(jnp.abs(y - y_ref.astype(y.dtype))))
    assert jnp.allclose(y, y_ref.astype(y.dtype), atol=2e-2, rtol=2e-2), err

    # Loose check against the full-f32 reference (bf16 rounding tolerance).
    h32 = x.reshape(-1, D) @ w1 + b1
    y32 = (_gelu_tanh(h32) @ w2 + b2).reshape(B, S, D)
    assert jnp.allclose(y, y32, atol=5e-2, rtol=5e-2)

    print("KERNEL_OK")
</pallas_src>

<mosaic_0001>
module attributes {stable_mosaic.version = 11 : i64} {
  func.func @_mlp_kernel_resident(%arg0: i32, %arg1: memref<16x128xbf16, #tpu.memory_space<vmem>>, %arg2: memref<128x128xbf16, #tpu.memory_space<vmem>>, %arg3: memref<1x128xf32, #tpu.memory_space<vmem>>, %arg4: memref<128x128xbf16, #tpu.memory_space<vmem>>, %arg5: memref<1x128xf32, #tpu.memory_space<vmem>>, %arg6: memref<16x128xf32, #tpu.memory_space<vmem>>) attributes {dimension_semantics = [#tpu.dimension_semantics<parallel>], iteration_bounds = array<i64: 1>, scalar_prefetch = 0 : i64, scratch_operands = 0 : i64, tpu.core_type = #tpu.core_type<tc>, window_params = [{transform_indices = @transform_0, window_bounds = array<i64: 16, 128>}, {pipeline_mode = #tpu.pipeline_mode<synchronous>, transform_indices = @transform_1, window_bounds = array<i64: 128, 128>}, {pipeline_mode = #tpu.pipeline_mode<synchronous>, transform_indices = @transform_2, window_bounds = array<i64: 1, 128>}, {pipeline_mode = #tpu.pipeline_mode<synchronous>, transform_indices = @transform_3, window_bounds = array<i64: 128, 128>}, {pipeline_mode = #tpu.pipeline_mode<synchronous>, transform_indices = @transform_4, window_bounds = array<i64: 1, 128>}, {transform_indices = @transform_5, window_bounds = array<i64: 16, 128>}]} {
    %c0 = arith.constant 0 : index
    %c0_0 = arith.constant 0 : index
    %0 = vector.load %arg1[%c0, %c0_0] : memref<16x128xbf16, #tpu.memory_space<vmem>>, vector<16x128xbf16>
    %c0_1 = arith.constant 0 : index
    %c0_2 = arith.constant 0 : index
    %1 = vector.load %arg2[%c0_1, %c0_2] : memref<128x128xbf16, #tpu.memory_space<vmem>>, vector<128x128xbf16>
    %cst = arith.constant dense<0.000000e+00> : vector<16x128xf32>
    %2 = tpu.matmul %0, %1, %cst {dimension_numbers = #tpu.dot_dimension_numbers<[1], [0], [0], [1], [0, 0, 1, 1], [], []>} : vector<16x128xbf16>, vector<128x128xbf16>, vector<16x128xf32> -> vector<16x128xf32>
    %c0_3 = arith.constant 0 : index
    %c0_4 = arith.constant 0 : index
    %3 = vector.load %arg3[%c0_3, %c0_4] : memref<1x128xf32, #tpu.memory_space<vmem>>, vector<1x128xf32>
    %4 = vector.broadcast %3 : vector<1x128xf32> to vector<16x128xf32>
    %5 = arith.addf %2, %4 : vector<16x128xf32>
    %cst_5 = arith.constant 5.000000e-01 : f32
    %6 = vector.broadcast %cst_5 : f32 to vector<16x128xf32>
    %7 = arith.mulf %6, %5 : vector<16x128xf32>
    %cst_6 = arith.constant 4.471500e-02 : f32
    %8 = vector.broadcast %cst_6 : f32 to vector<16x128xf32>
    %9 = arith.mulf %8, %5 : vector<16x128xf32>
    %10 = arith.mulf %9, %5 : vector<16x128xf32>
    %11 = arith.mulf %10, %5 : vector<16x128xf32>
    %12 = arith.addf %5, %11 : vector<16x128xf32>
    %cst_7 = arith.constant 0.797884583 : f32
    %13 = vector.broadcast %cst_7 : f32 to vector<16x128xf32>
    %14 = arith.mulf %13, %12 : vector<16x128xf32>
    %15 = math.tanh %14 : vector<16x128xf32>
    %cst_8 = arith.constant 1.000000e+00 : f32
    %16 = vector.broadcast %cst_8 : f32 to vector<16x128xf32>
    %17 = arith.addf %16, %15 : vector<16x128xf32>
    %18 = arith.mulf %7, %17 : vector<16x128xf32>
    %19 = arith.truncf %18 : vector<16x128xf32> to vector<16x128xbf16>
    %c0_9 = arith.constant 0 : index
    %c0_10 = arith.constant 0 : index
    %20 = vector.load %arg4[%c0_9, %c0_10] : memref<128x128xbf16, #tpu.memory_space<vmem>>, vector<128x128xbf16>
    %cst_11 = arith.constant dense<0.000000e+00> : vector<16x128xf32>
    %21 = tpu.matmul %19, %20, %cst_11 {dimension_numbers = #tpu.dot_dimension_numbers<[1], [0], [0], [1], [0, 0, 1, 1], [], []>} : vector<16x128xbf16>, vector<128x128xbf16>, vector<16x128xf32> -> vector<16x128xf32>
    %c0_12 = arith.constant 0 : index
    %c0_13 = arith.constant 0 : index
    %22 = vector.load %arg5[%c0_12, %c0_13] : memref<1x128xf32, #tpu.memory_space<vmem>>, vector<1x128xf32>
    %23 = vector.broadcast %22 : vector<1x128xf32> to vector<16x128xf32>
    %24 = arith.addf %21, %23 : vector<16x128xf32>
    %c0_14 = arith.constant 0 : index
    %c0_15 = arith.constant 0 : index
    %25 = vector.load %arg6[%c0_14, %c0_15] : memref<16x128xf32, #tpu.memory_space<vmem>>, vector<16x128xf32>
    tpu.vector_store %arg6[%c0_14, %c0_15], %24 {strides = array<i32>} : memref<16x128xf32, #tpu.memory_space<vmem>>, vector<16x128xf32>,
    return
  }
  func.func @transform_0(%arg0: i32) -> (i32, i32) {
    %c0_i32 = arith.constant 0 : i32
    %c0_i32_0 = arith.constant 0 : i32
    return %arg0, %c0_i32 : i32, i32
  }
  func.func @transform_1(%arg0: i32) -> (i32, i32) {
    %c0_i32 = arith.constant 0 : i32
    %c0_i32_0 = arith.constant 0 : i32
    %c0_i32_1 = arith.constant 0 : i32
    return %c0_i32, %c0_i32_0 : i32, i32
  }
  func.func @transform_2(%arg0: i32) -> (i32, i32) {
    %c0_i32 = arith.constant 0 : i32
    %c0_i32_0 = arith.constant 0 : i32
    %c0_i32_1 = arith.constant 0 : i32
    return %c0_i32, %c0_i32_0 : i32, i32
  }
  func.func @transform_3(%arg0: i32) -> (i32, i32) {
    %c0_i32 = arith.constant 0 : i32
    %c0_i32_0 = arith.constant 0 : i32
    %c0_i32_1 = arith.constant 0 : i32
    return %c0_i32, %c0_i32_0 : i32, i32
  }
  func.func @transform_4(%arg0: i32) -> (i32, i32) {
    %c0_i32 = arith.constant 0 : i32
    %c0_i32_0 = arith.constant 0 : i32
    %c0_i32_1 = arith.constant 0 : i32
    return %c0_i32, %c0_i32_0 : i32, i32
  }
  func.func @transform_5(%arg0: i32) -> (i32, i32) {
    %c0_i32 = arith.constant 0 : i32
    %c0_i32_0 = arith.constant 0 : i32
    return %arg0, %c0_i32 : i32, i32
  }
}

</mosaic_0001>

<bundles_post_ra>
// kernel: tpu_custom_call.1
= control target key start
LH: loop header
LB: loop body
LE: loop exit
PB: predicated region body
PF: predicated region fallthrough
CT: control target
= control target key end

     0   :  { %10 = vsyncpa [#allocation3], 0  ;;  %s538_s0 = inlined_call_operand.hbm [shape: bf16[16,128], index: 0, kind: input, shape index: {}]   ;;  %s539_s1 = inlined_call_operand.hbm [shape: bf16[128,128], index: 1, kind: input, shape index: {}]   ;;  %s540_s2 = inlined_call_operand.vmem [shape: f32[1,128], index: 2, kind: input, shape index: {}]   ;;  %s541_s3 = inlined_call_operand.hbm [shape: bf16[128,128], index: 3, kind: input, shape index: {}]   ;;  %s542_s4 = inlined_call_operand.vmem [shape: f32[1,128], index: 4, kind: input, shape index: {}]   ;;  %s543_s5 = inlined_call_operand.hbm [shape: f32[16,128], index: 5, kind: output, shape index: {}]  }
   0x1   :  { %11 = vsyncpa [#allocation6], 0 }
   0x2   :  { %12 = vsyncpa [#allocation4], 0  ;;  %s30_s20 = sshll.u32 %s539_s1, 4  ;;  %s482_s21 = smov [#allocation5]   ;;  %s31_s20 = int_to_ptr.hbm [resolvable:$true] %s30_s20 }
   0x3   :  { %s32_s22 = sshll.u32 %s482_s21, 4  ;;  %s17_s25 = sshll.u32 %s538_s0, 4  ;;  %s33_s22 = int_to_ptr.vmem [resolvable:$true] %s32_s22  ;;  %s18_s25 = int_to_ptr.hbm [resolvable:$true] %s17_s25 }
   0x4   :  { %s483_s26 = smov 64   ;;  %s484_s27 = smov 4  }
   0x5   :  { %38 = dma.hbm_to_vmem [thread:$0]  %s31_s20, 1024, %s33_s22, [#allocation6], %s483_s26, %s483_s26, %s484_s27  }
   0x6   :  { %s485_s28 = smov [#allocation2]   ;;  %s45_s7 = sshll.u32 %s541_s3, 4  ;;  %s46_s7 = int_to_ptr.hbm [resolvable:$true] %s45_s7 }
   0x7   :  { %s19_s29 = sshll.u32 %s485_s28, 4  ;;  %s486_s1 = smov [#allocation7]   ;;  %s20_s29 = int_to_ptr.vmem [resolvable:$true] %s19_s29 }
   0x8   :  { %25 = dma.hbm_to_vmem [thread:$0]  %s18_s25, 128, %s20_s29, [#allocation3], %s483_s26, %s483_s26, %s484_s27  }
   0x9   :  { %s47_s8 = sshll.u32 %s486_s1, 4  ;;  %s48_s8 = int_to_ptr.vmem [resolvable:$true] %s47_s8 }
   0xa   :  { %53 = dma.hbm_to_vmem [thread:$0]  %s46_s7, 1024, %s48_s8, [#allocation6], %s483_s26, %s483_s26, %s484_s27  }
   0xb   :  { %476 = dma.done.wait [#allocation3], 128  }
   0xc   :  { %477 = vsyncadd [#allocation3], 4294967168 }
   0xd   :  { %478 = dma.done.wait [#allocation6], 2048  }
   0xe   :  { %479 = vsyncadd [#allocation6], 4294965248  ;;  %v357_v0 = vld [vmem:[#allocation5 + $0x38] sm:$0xff]  ;;  %v356_v1 = vld [vmem:[#allocation5 + $0x30] sm:$0xff]  ;;  %s487_s10 = smov [#allocation8]   ;;  %s267_s14 = sshll.u32 %s543_s5, 4  ;;  %s268_s14 = int_to_ptr.hbm [resolvable:$true] %s267_s14 }
   0xf   :  { %144 = vmatpush.bf16.msra.mxu0 %v357_v0  ;;  %v355_v2 = vld [vmem:[#allocation5 + $0x28] sm:$0xff]  ;;  %v354_v3 = vld [vmem:[#allocation5 + $0x20] sm:$0xff]  ;;  %v353_v4 = vld [vmem:[#allocation5 + $0x18] sm:$0xff]  ;;  %s265_s11 = sshll.u32 %s487_s10, 4  ;;  %s488_s15 = smov 128   ;;  %s266_s11 = int_to_ptr.vmem [resolvable:$true] %s265_s11 }
  0x10   :  { %v352_v5 = vld [vmem:[#allocation5 + $0x10] sm:$0xff]  ;;  %v351_v6 = vld [vmem:[#allocation5 + $0x8] sm:$0xff]  ;;  %v350_v7 = vld [vmem:[#allocation5] sm:$0xff]  ;;  %s489_s16 = smov 8  }
  0x11   :  { %v349_v8 = vld [vmem:[#allocation2] sm:$0xff]  ;;  %v364_v10 = vld [vmem:[#allocation7 + $0x30] sm:$0xff]  ;;  %v363_v11 = vld [vmem:[#allocation7 + $0x28] sm:$0xff] }
  0x12   :  { %v365_v9 = vld [vmem:[#allocation7 + $0x38] sm:$0xff]  ;;  %v362_v12 = vld [vmem:[#allocation7 + $0x20] sm:$0xff]  ;;  %v360_v14 = vld [vmem:[#allocation7 + $0x10] sm:$0xff] }
  0x13   :  { %145 = vmatpush.bf16.msra.mxu0 %v356_v1  ;;  %245 = vmatpush.bf16.msra.mxu1 %v365_v9  ;;  %v361_v13 = vld [vmem:[#allocation7 + $0x18] sm:$0xff]  ;;  %v359_v15 = vld [vmem:[#allocation7 + $0x8] sm:$0xff]  ;;  %v358_v16 = vld [vmem:[#allocation7] sm:$0xff] }
  0x14   :  { %v374_v17 = vld [vmem:[%s540_s2] ss:$0 sm:$0xff] }
  0x15   :  { %v375_v41 = vld [vmem:[%s542_s4] ss:$0 sm:$0xff] }
  0x17   :  { %146 = vmatpush.bf16.msra.mxu0 %v355_v2  ;;  %246 = vmatpush.bf16.msra.mxu1 %v364_v10 }
  0x1b   :  { %147 = vmatpush.bf16.msra.mxu0 %v354_v3  ;;  %247 = vmatpush.bf16.msra.mxu1 %v363_v11 }
  0x1f   :  { %148 = vmatpush.bf16.msra.mxu0 %v353_v4  ;;  %248 = vmatpush.bf16.msra.mxu1 %v362_v12 }
  0x23   :  { %149 = vmatpush.bf16.msra.mxu0 %v352_v5  ;;  %249 = vmatpush.bf16.msra.mxu1 %v361_v13 }
  0x27   :  { %150 = vmatpush.bf16.msra.mxu0 %v351_v6  ;;  %250 = vmatpush.bf16.msra.mxu1 %v360_v14 }
  0x2b   :  { %151 = vmatpush.bf16.msra.mxu0 %v350_v7  ;;  %251 = vmatpush.bf16.msra.mxu1 %v359_v15 }
  0x2e   :  { %152 = vmatmul.bf16.vlgmr.msra.gmra.mxu0 %v349_v8 }
  0x2f   :  { %252 = vmatpush.bf16.msra.mxu1 %v358_v16 }
  0xab   :  { %v153_v18 = vpop.f32.mrf.mxu0 }
  0xac   :  { %v154_v19 = vadd.f32 %v374_v17, %v153_v18 }
  0xae   :  { %v160_v20 = vmul.f32 0.044715, %v154_v19  ;;  %v158_v35 = vmul.f32 0.5, %v154_v19 }
  0xb0   :  { %v162_v21 = vmul.f32 %v160_v20, %v154_v19 }
  0xb2   :  { %v164_v22 = vmul.f32 %v162_v21, %v154_v19 }
  0xb3   :  { %v155_v23 = vpop.f32.mrf.mxu0 }
  0xb4   :  { %v156_v24 = vadd.f32 %v374_v17, %v155_v23  ;;  %v166_v25 = vadd.f32 %v164_v22, %v154_v19 }
  0xb6   :  { %v161_v26 = vmul.f32 0.044715, %v156_v24  ;;  %v168_v28 = vmul.f32 0.7978846, %v166_v25  ;;  %v159_v36 = vmul.f32 0.5, %v156_v24 }
  0xb8   :  { %v163_v27 = vmul.f32 %v161_v26, %v156_v24  ;;  %376 = vtanh.f32 %v168_v28 }
  0xba   :  { %v165_v29 = vmul.f32 %v163_v27, %v156_v24 }
  0xbc   :  { %v167_v30 = vadd.f32 %v165_v29, %v156_v24 }
  0xbe   :  { %v169_v31 = vmul.f32 0.7978846, %v167_v30  ;;  %v377_v32 = vpop.eup %376 }
  0xbf   :  { %v172_v33 = vadd.f32 1.0, %v377_v32 }
  0xc0   :  { %378 = vtanh.f32 %v169_v31 }
  0xc1   :  { %v174_v38 = vmul.f32 %v172_v33, %v158_v35 }
  0xc6   :  { %v379_v34 = vpop.eup %378 }
  0xc7   :  { %v173_v37 = vadd.f32 1.0, %v379_v34 }
  0xc9   :  { %v175_v39 = vmul.f32 %v173_v37, %v159_v36 }
  0xcb   :  { %v176_v40 = vpack.c.bf16 %v175_v39, %v174_v38 }
  0xcd   :  { %253 = vmatmul.bf16.vlgmr.msra.gmra.mxu1 %v176_v40 }
 0x14a   :  { %v254_v42 = vpop.f32.mrf.mxu1 }
 0x14b   :  { %v255_v43 = vadd.f32 %v375_v41, %v254_v42 }
 0x14d   :  { %259 = vst [vmem:[#allocation8] sm:$0xff] %v255_v43 }
 0x152   :  { %v256_v44 = vpop.f32.mrf.mxu1 }
 0x153   :  { %v257_v45 = vadd.f32 %v375_v41, %v256_v44 }
 0x155   :  { %260 = vst [vmem:[#allocation8 + $0x8] sm:$0xff] %v257_v45 }
 0x156   :  { %273 = dma.vmem_to_hbm [thread:$0]  %s266_s11, 256, %s268_s14, [#allocation4], %s488_s15, %s488_s15, %s489_s16  }
 0x157   :  { %480 = dma.done.wait [#allocation4], 256  }
 0x158   :  { %481 = vsyncadd [#allocation4], 4294967040 }
 0x159   :  { %278 = vsyncpa [#allocation3], 1 }
 0x15a   :  { %279 = vsyncpa [#allocation6], 1 }
 0x15b   :  { %280 = vsyncpa [#allocation4], 1 }

</bundles_post_ra>
